<compile_context>
chip_gen: v7x
topology: tpu7x:2x2x1
jax: 0.10.0
libtpu: 0.0.40
codegen_flags: <defaults>
</compile_context>

<pallas_src>
import math

import jax
import jax.numpy as jnp
from jax.experimental import pallas as pl
from jax.experimental.pallas import tpu as pltpu

# Logical layer sizes of the PyTorch module.
D_IN, H1, H2, H3, D_OUT = 7, 512, 256, 128, 2
# TPU-friendly padded feature sizes (last-dim block equals the full array dim,
# which is legal even when < 128).
D_IN_P, D_OUT_P = 16, 8
# Max batch-tile rows per grid step (acts + weights ~6-7 MB VMEM at 1024 rows:
# comfortably inside every generation's scoped VMEM once the limit is raised).
TB_MAX = 1024


def _mlp_kernel(x_ref, w1_ref, b1_ref, w2_ref, b2_ref,
                w3_ref, b3_ref, w4_ref, b4_ref, o_ref):
    # x arrives already in bf16; all matmuls run bf16 on the MXU with f32
    # accumulation, bias add / ReLU in f32 on the VPU.
    x = x_ref[...]

    h = jnp.dot(x, w1_ref[...], preferred_element_type=jnp.float32) + b1_ref[...]
    h = jnp.maximum(h, 0.0)

    h = jnp.dot(h.astype(jnp.bfloat16), w2_ref[...],
                preferred_element_type=jnp.float32) + b2_ref[...]
    h = jnp.maximum(h, 0.0)

    h = jnp.dot(h.astype(jnp.bfloat16), w3_ref[...],
                preferred_element_type=jnp.float32) + b3_ref[...]
    h = jnp.maximum(h, 0.0)

    out = jnp.dot(h.astype(jnp.bfloat16), w4_ref[...],
                  preferred_element_type=jnp.float32) + b4_ref[...]
    o_ref[...] = out.astype(o_ref.dtype)


def prepare_params(params):
    """Pad / cast the raw f32 params ONCE; reuse the result across calls."""
    w1, b1, w2, b2, w3, b3, w4, b4 = params
    w1_p = jnp.zeros((D_IN_P, H1), jnp.bfloat16).at[:D_IN, :].set(
        w1.astype(jnp.bfloat16))
    w4_p = jnp.zeros((H3, D_OUT_P), jnp.bfloat16).at[:, :D_OUT].set(
        w4.astype(jnp.bfloat16))
    b4_p = jnp.zeros((1, D_OUT_P), jnp.float32).at[:, :D_OUT].set(b4)
    return (w1_p, b1.reshape(1, H1).astype(jnp.float32),
            w2.astype(jnp.bfloat16), b2.reshape(1, H2).astype(jnp.float32),
            w3.astype(jnp.bfloat16), b3.reshape(1, H3).astype(jnp.float32),
            w4_p, b4_p)


def _pick_batch_tile(B):
    """Balanced batch tiling: minimize zero-row padding, TB multiple of 16."""
    n_chunks = -(-B // TB_MAX)                 # ceil(B / TB_MAX)
    tb = -(-B // n_chunks)                     # ceil(B / n_chunks)
    tb = ((tb + 15) // 16) * 16                # bf16-friendly sublane multiple
    n_tiles = -(-B // tb)
    return tb, n_tiles, n_tiles * tb


@jax.jit
def qnetwork_forward(x, prepared):
    """x: (B, 7) float32 -> (B, 2) float32, matching QNetwork.forward."""
    w1, b1, w2, b2, w3, b3, w4, b4 = prepared
    B = x.shape[0]

    TB, n_tiles, B_pad = _pick_batch_tile(B)

    # Pad batch rows with zeros, features 7 -> 16 lanes, and cast to bf16 once
    # here (the kernel feeds bf16 to the MXU anyway) to halve the x DMA.
    x_p = jnp.zeros((B_pad, D_IN_P), jnp.bfloat16).at[:B, :D_IN].set(
        x.astype(jnp.bfloat16))

    flops = 2 * B_pad * (D_IN_P * H1 + H1 * H2 + H2 * H3 + H3 * D_OUT_P)
    bytes_w = 2 * (D_IN_P * H1 + H1 * H2 + H2 * H3 + H3 * D_OUT_P) \
        + 4 * (H1 + H2 + H3 + D_OUT_P)
    bytes_accessed = bytes_w + 2 * B_pad * D_IN_P + 4 * B_pad * D_OUT_P

    out_p = pl.pallas_call(
        _mlp_kernel,
        out_shape=jax.ShapeDtypeStruct((B_pad, D_OUT_P), jnp.float32),
        grid=(n_tiles,),
        in_specs=[
            pl.BlockSpec((TB, D_IN_P), lambda i: (i, 0)),      # x (tiled, bf16)
            pl.BlockSpec((D_IN_P, H1), lambda i: (0, 0)),      # w1 (resident)
            pl.BlockSpec((1, H1), lambda i: (0, 0)),           # b1
            pl.BlockSpec((H1, H2), lambda i: (0, 0)),          # w2
            pl.BlockSpec((1, H2), lambda i: (0, 0)),           # b2
            pl.BlockSpec((H2, H3), lambda i: (0, 0)),          # w3
            pl.BlockSpec((1, H3), lambda i: (0, 0)),           # b3
            pl.BlockSpec((H3, D_OUT_P), lambda i: (0, 0)),     # w4
            pl.BlockSpec((1, D_OUT_P), lambda i: (0, 0)),      # b4
        ],
        out_specs=pl.BlockSpec((TB, D_OUT_P), lambda i: (i, 0)),
        compiler_params=pltpu.CompilerParams(
            dimension_semantics=("parallel",),                 # megacore shard
            vmem_limit_bytes=48 * 1024 * 1024),                # < v7x 64 MiB
        cost_estimate=pl.CostEstimate(
            flops=flops, transcendentals=0, bytes_accessed=bytes_accessed),
    )(x_p, w1, b1, w2, b2, w3, b3, w4, b4)

    return out_p[:B, :D_OUT]


def init_params(key):
    """Deterministic init mimicking nn.Linear's U(-1/sqrt(fan_in), +1/sqrt(fan_in))."""
    dims = [(D_IN, H1), (H1, H2), (H2, H3), (H3, D_OUT)]
    params = []
    for (fan_in, fan_out) in dims:
        key, kw, kb = jax.random.split(key, 3)
        bound = 1.0 / math.sqrt(float(fan_in))
        w = jax.random.uniform(kw, (fan_in, fan_out), jnp.float32, -bound, bound)
        b = jax.random.uniform(kb, (fan_out,), jnp.float32, -bound, bound)
        params += [w, b]
    return tuple(params)


def _reference(x, params):
    w1, b1, w2, b2, w3, b3, w4, b4 = params
    h = jax.nn.relu(x @ w1 + b1)
    h = jax.nn.relu(h @ w2 + b2)
    h = jax.nn.relu(h @ w3 + b3)
    return h @ w4 + b4


if __name__ == "__main__":
    key = jax.random.PRNGKey(0)
    key, kx1, kx2, kx3 = jax.random.split(key, 4)
    params = init_params(key)
    prepared = prepare_params(params)

    # bf16 MXU path vs f32 reference: allow typical bf16 matmul error.
    TOL = dict(atol=5e-2, rtol=5e-2)

    # Small batch (single 16-row tile).
    batch = 2
    x = jax.random.normal(kx1, (batch, D_IN), jnp.float32)
    out = qnetwork_forward(x, prepared)
    jax.block_until_ready(out)
    ref = _reference(x, params)
    assert out.shape == (batch, D_OUT)
    assert jnp.allclose(out, ref, **TOL), (out, ref)

    # Odd batch: balanced tiling -> one 528-row tile (<2% padding waste).
    batch2 = 520
    x2 = jax.random.normal(kx2, (batch2, D_IN), jnp.float32)
    out2 = qnetwork_forward(x2, prepared)
    jax.block_until_ready(out2)
    ref2 = _reference(x2, params)
    assert out2.shape == (batch2, D_OUT)
    assert jnp.allclose(out2, ref2, **TOL)

    # Large batch exercising the multi-tile grid path (3 balanced tiles).
    batch3 = 2600
    x3 = jax.random.normal(kx3, (batch3, D_IN), jnp.float32)
    out3 = qnetwork_forward(x3, prepared)
    jax.block_until_ready(out3)
    ref3 = _reference(x3, params)
    assert out3.shape == (batch3, D_OUT)
    assert jnp.allclose(out3, ref3, **TOL)

    print("KERNEL_OK")
</pallas_src>

<mosaic_0001>
module attributes {stable_mosaic.version = 11 : i64} {
  func.func @_mlp_kernel(%arg0: i32, %arg1: memref<16x16xbf16, #tpu.memory_space<vmem>>, %arg2: memref<16x512xbf16, #tpu.memory_space<vmem>>, %arg3: memref<1x512xf32, #tpu.memory_space<vmem>>, %arg4: memref<512x256xbf16, #tpu.memory_space<vmem>>, %arg5: memref<1x256xf32, #tpu.memory_space<vmem>>, %arg6: memref<256x128xbf16, #tpu.memory_space<vmem>>, %arg7: memref<1x128xf32, #tpu.memory_space<vmem>>, %arg8: memref<128x8xbf16, #tpu.memory_space<vmem>>, %arg9: memref<1x8xf32, #tpu.memory_space<vmem>>, %arg10: memref<16x8xf32, #tpu.memory_space<vmem>>) attributes {dimension_semantics = [#tpu.dimension_semantics<parallel>], iteration_bounds = array<i64: 1>, scalar_prefetch = 0 : i64, scratch_operands = 0 : i64, tpu.core_type = #tpu.core_type<tc>, window_params = [{transform_indices = @transform_0, window_bounds = array<i64: 16, 16>}, {pipeline_mode = #tpu.pipeline_mode<synchronous>, transform_indices = @transform_1, window_bounds = array<i64: 16, 512>}, {pipeline_mode = #tpu.pipeline_mode<synchronous>, transform_indices = @transform_2, window_bounds = array<i64: 1, 512>}, {pipeline_mode = #tpu.pipeline_mode<synchronous>, transform_indices = @transform_3, window_bounds = array<i64: 512, 256>}, {pipeline_mode = #tpu.pipeline_mode<synchronous>, transform_indices = @transform_4, window_bounds = array<i64: 1, 256>}, {pipeline_mode = #tpu.pipeline_mode<synchronous>, transform_indices = @transform_5, window_bounds = array<i64: 256, 128>}, {pipeline_mode = #tpu.pipeline_mode<synchronous>, transform_indices = @transform_6, window_bounds = array<i64: 1, 128>}, {pipeline_mode = #tpu.pipeline_mode<synchronous>, transform_indices = @transform_7, window_bounds = array<i64: 128, 8>}, {pipeline_mode = #tpu.pipeline_mode<synchronous>, transform_indices = @transform_8, window_bounds = array<i64: 1, 8>}, {transform_indices = @transform_9, window_bounds = array<i64: 16, 8>}]} {
    %c0 = arith.constant 0 : index
    %c0_0 = arith.constant 0 : index
    %0 = vector.load %arg1[%c0, %c0_0] : memref<16x16xbf16, #tpu.memory_space<vmem>>, vector<16x16xbf16>
    %c0_1 = arith.constant 0 : index
    %c0_2 = arith.constant 0 : index
    %1 = vector.load %arg2[%c0_1, %c0_2] : memref<16x512xbf16, #tpu.memory_space<vmem>>, vector<16x512xbf16>
    %cst = arith.constant dense<0.000000e+00> : vector<16x512xf32>
    %2 = tpu.matmul %0, %1, %cst {dimension_numbers = #tpu.dot_dimension_numbers<[1], [0], [0], [1], [0, 0, 1, 1], [], []>} : vector<16x16xbf16>, vector<16x512xbf16>, vector<16x512xf32> -> vector<16x512xf32>
    %c0_3 = arith.constant 0 : index
    %c0_4 = arith.constant 0 : index
    %3 = vector.load %arg3[%c0_3, %c0_4] : memref<1x512xf32, #tpu.memory_space<vmem>>, vector<1x512xf32>
    %4 = vector.broadcast %3 : vector<1x512xf32> to vector<16x512xf32>
    %5 = arith.addf %2, %4 : vector<16x512xf32>
    %cst_5 = arith.constant 0.000000e+00 : f32
    %6 = vector.broadcast %cst_5 : f32 to vector<16x512xf32>
    %7 = arith.maximumf %5, %6 : vector<16x512xf32>
    %8 = arith.truncf %7 : vector<16x512xf32> to vector<16x512xbf16>
    %c0_6 = arith.constant 0 : index
    %c0_7 = arith.constant 0 : index
    %9 = vector.load %arg4[%c0_6, %c0_7] : memref<512x256xbf16, #tpu.memory_space<vmem>>, vector<512x256xbf16>
    %cst_8 = arith.constant dense<0.000000e+00> : vector<16x256xf32>
    %10 = tpu.matmul %8, %9, %cst_8 {dimension_numbers = #tpu.dot_dimension_numbers<[1], [0], [0], [1], [0, 0, 1, 1], [], []>} : vector<16x512xbf16>, vector<512x256xbf16>, vector<16x256xf32> -> vector<16x256xf32>
    %c0_9 = arith.constant 0 : index
    %c0_10 = arith.constant 0 : index
    %11 = vector.load %arg5[%c0_9, %c0_10] : memref<1x256xf32, #tpu.memory_space<vmem>>, vector<1x256xf32>
    %12 = vector.broadcast %11 : vector<1x256xf32> to vector<16x256xf32>
    %13 = arith.addf %10, %12 : vector<16x256xf32>
    %cst_11 = arith.constant 0.000000e+00 : f32
    %14 = vector.broadcast %cst_11 : f32 to vector<16x256xf32>
    %15 = arith.maximumf %13, %14 : vector<16x256xf32>
    %16 = arith.truncf %15 : vector<16x256xf32> to vector<16x256xbf16>
    %c0_12 = arith.constant 0 : index
    %c0_13 = arith.constant 0 : index
    %17 = vector.load %arg6[%c0_12, %c0_13] : memref<256x128xbf16, #tpu.memory_space<vmem>>, vector<256x128xbf16>
    %cst_14 = arith.constant dense<0.000000e+00> : vector<16x128xf32>
    %18 = tpu.matmul %16, %17, %cst_14 {dimension_numbers = #tpu.dot_dimension_numbers<[1], [0], [0], [1], [0, 0, 1, 1], [], []>} : vector<16x256xbf16>, vector<256x128xbf16>, vector<16x128xf32> -> vector<16x128xf32>
    %c0_15 = arith.constant 0 : index
    %c0_16 = arith.constant 0 : index
    %19 = vector.load %arg7[%c0_15, %c0_16] : memref<1x128xf32, #tpu.memory_space<vmem>>, vector<1x128xf32>
    %20 = vector.broadcast %19 : vector<1x128xf32> to vector<16x128xf32>
    %21 = arith.addf %18, %20 : vector<16x128xf32>
    %cst_17 = arith.constant 0.000000e+00 : f32
    %22 = vector.broadcast %cst_17 : f32 to vector<16x128xf32>
    %23 = arith.maximumf %21, %22 : vector<16x128xf32>
    %24 = arith.truncf %23 : vector<16x128xf32> to vector<16x128xbf16>
    %c0_18 = arith.constant 0 : index
    %c0_19 = arith.constant 0 : index
    %25 = vector.load %arg8[%c0_18, %c0_19] : memref<128x8xbf16, #tpu.memory_space<vmem>>, vector<128x8xbf16>
    %cst_20 = arith.constant dense<0.000000e+00> : vector<16x8xf32>
    %26 = tpu.matmul %24, %25, %cst_20 {dimension_numbers = #tpu.dot_dimension_numbers<[1], [0], [0], [1], [0, 0, 1, 1], [], []>} : vector<16x128xbf16>, vector<128x8xbf16>, vector<16x8xf32> -> vector<16x8xf32>
    %c0_21 = arith.constant 0 : index
    %c0_22 = arith.constant 0 : index
    %27 = vector.load %arg9[%c0_21, %c0_22] : memref<1x8xf32, #tpu.memory_space<vmem>>, vector<1x8xf32>
    %28 = vector.broadcast %27 : vector<1x8xf32> to vector<16x8xf32>
    %29 = arith.addf %26, %28 : vector<16x8xf32>
    %c0_23 = arith.constant 0 : index
    %c0_24 = arith.constant 0 : index
    %30 = vector.load %arg10[%c0_23, %c0_24] : memref<16x8xf32, #tpu.memory_space<vmem>>, vector<16x8xf32>
    tpu.vector_store %arg10[%c0_23, %c0_24], %29 {strides = array<i32>} : memref<16x8xf32, #tpu.memory_space<vmem>>, vector<16x8xf32>,
    return
  }
  func.func @transform_0(%arg0: i32) -> (i32, i32) {
    %c0_i32 = arith.constant 0 : i32
    %c0_i32_0 = arith.constant 0 : i32
    return %arg0, %c0_i32 : i32, i32
  }
  func.func @transform_1(%arg0: i32) -> (i32, i32) {
    %c0_i32 = arith.constant 0 : i32
    %c0_i32_0 = arith.constant 0 : i32
    %c0_i32_1 = arith.constant 0 : i32
    return %c0_i32, %c0_i32_0 : i32, i32
  }
  func.func @transform_2(%arg0: i32) -> (i32, i32) {
    %c0_i32 = arith.constant 0 : i32
    %c0_i32_0 = arith.constant 0 : i32
    %c0_i32_1 = arith.constant 0 : i32
    return %c0_i32, %c0_i32_0 : i32, i32
  }
  func.func @transform_3(%arg0: i32) -> (i32, i32) {
    %c0_i32 = arith.constant 0 : i32
    %c0_i32_0 = arith.constant 0 : i32
    %c0_i32_1 = arith.constant 0 : i32
    return %c0_i32, %c0_i32_0 : i32, i32
  }
  func.func @transform_4(%arg0: i32) -> (i32, i32) {
    %c0_i32 = arith.constant 0 : i32
    %c0_i32_0 = arith.constant 0 : i32
    %c0_i32_1 = arith.constant 0 : i32
    return %c0_i32, %c0_i32_0 : i32, i32
  }
  func.func @transform_5(%arg0: i32) -> (i32, i32) {
    %c0_i32 = arith.constant 0 : i32
    %c0_i32_0 = arith.constant 0 : i32
    %c0_i32_1 = arith.constant 0 : i32
    return %c0_i32, %c0_i32_0 : i32, i32
  }
  func.func @transform_6(%arg0: i32) -> (i32, i32) {
    %c0_i32 = arith.constant 0 : i32
    %c0_i32_0 = arith.constant 0 : i32
    %c0_i32_1 = arith.constant 0 : i32
    return %c0_i32, %c0_i32_0 : i32, i32
  }
  func.func @transform_7(%arg0: i32) -> (i32, i32) {
    %c0_i32 = arith.constant 0 : i32
    %c0_i32_0 = arith.constant 0 : i32
    %c0_i32_1 = arith.constant 0 : i32
    return %c0_i32, %c0_i32_0 : i32, i32
  }
  func.func @transform_8(%arg0: i32) -> (i32, i32) {
    %c0_i32 = arith.constant 0 : i32
    %c0_i32_0 = arith.constant 0 : i32
    %c0_i32_1 = arith.constant 0 : i32
    return %c0_i32, %c0_i32_0 : i32, i32
  }
  func.func @transform_9(%arg0: i32) -> (i32, i32) {
    %c0_i32 = arith.constant 0 : i32
    %c0_i32_0 = arith.constant 0 : i32
    return %arg0, %c0_i32 : i32, i32
  }
}

</mosaic_0001>

<bundles_post_ra>
// kernel: qnetwork_forward.1
= control target key start
LH: loop header
LB: loop body
LE: loop exit
PB: predicated region body
PF: predicated region fallthrough
CT: control target
= control target key end

     0   :  { %14 = vsyncpa [#allocation3], 0  ;;  %s1500_s0 = inlined_call_operand.vmem [shape: bf16[16,16], index: 0, kind: input, shape index: {}]   ;;  %s1501_s1 = inlined_call_operand.vmem [shape: bf16[16,512], index: 1, kind: input, shape index: {}]   ;;  %s1502_s2 = inlined_call_operand.vmem [shape: f32[1,512], index: 2, kind: input, shape index: {}]   ;;  %s1503_s3 = inlined_call_operand.hbm [shape: bf16[512,256], index: 3, kind: input, shape index: {}]   ;;  %s1504_s4 = inlined_call_operand.vmem [shape: f32[1,256], index: 4, kind: input, shape index: {}]   ;;  %s1505_s5 = inlined_call_operand.hbm [shape: bf16[256,128], index: 5, kind: input, shape index: {}]   ;;  %s1506_s6 = inlined_call_operand.vmem [shape: f32[1,128], index: 6, kind: input, shape index: {}]   ;;  %s1507_s7 = inlined_call_operand.vmem [shape: bf16[128,8], index: 7, kind: input, shape index: {}]   ;;  %s1508_s8 = inlined_call_operand.vmem [shape: f32[1,8], index: 8, kind: input, shape index: {}]   ;;  %s1509_s9 = inlined_call_operand.vmem [shape: f32[16,8], index: 9, kind: output, shape index: {}]  }
   0x1   :  { %15 = vsyncpa [#allocation5], 0  ;;  %s1344_s30 = smov [#allocation2]   ;;  %s1296_s13 = scalar_lea.hbm %s1503_s3, 8192 }
   0x2   :  { %s27_s10 = sshll.u32 %s1344_s30, 4  ;;  %p1297_p0 = scmp.ne.s32.totalorder %s1503_s3, %s1296_s13  ;;  %s28_s10 = int_to_ptr.vmem [resolvable:$true] %s27_s10 }
   0x3   :  { %p1300_p1 = scmp.lt.u32.totalorder %s1296_s13, %s1503_s3 }
   0x5   :  { %p1302_p2 = pnand %p1300_p1, %p1297_p0 }
   0x7   :  { %1305 = shalt.err (!%p1302_p2)
}
   0x8   :  { %s1306_s18 = scalar_lea.vmem %s28_s10, 8192  ;;  %p1311_p4 = scmp.lt.s32.totalorder %s28_s10, %s28_s10 }
   0x9   :  { %p1307_p3 = scmp.ne.s32.totalorder %s28_s10, %s1306_s18  ;;  %p1312_p5 = scmp.lt.s32.totalorder %s1306_s18, %s1306_s18 }
   0xb   :  { %p1313_p6 = por %p1312_p5, %p1311_p4 }
   0xd   :  { %p1314_p7 = pnand %p1313_p6, %p1307_p3 }
   0xf   :  { %1317 = shalt.err (!%p1314_p7)
}
  0x10   :  { %s1345_s19 = smov 128   ;;  %s1346_s20 = smov 8  }
  0x11   :  { %33 = dma.hbm_to_vmem [thread:$0]  %s1503_s3, 8192, %s28_s10, [#allocation3], %s1345_s19, %s1345_s19, %s1346_s20  }
  0x12   :  { %s1347_s23 = smov [#allocation4]   ;;  %s1318_s27 = scalar_lea.hbm %s1505_s5, 2048 }
  0x13   :  { %s41_s24 = sshll.u32 %s1347_s23, 4  ;;  %p1319_p8 = scmp.ne.s32.totalorder %s1505_s5, %s1318_s27  ;;  %s42_s24 = int_to_ptr.vmem [resolvable:$true] %s41_s24 }
  0x14   :  { %p1322_p9 = scmp.lt.u32.totalorder %s1318_s27, %s1505_s5 }
  0x16   :  { %p1324_p10 = pnand %p1322_p9, %p1319_p8 }
  0x18   :  { %1327 = shalt.err (!%p1324_p10)
}
  0x19   :  { %s1328_s12 = scalar_lea.vmem %s42_s24, 2048  ;;  %p1333_p12 = scmp.lt.s32.totalorder %s42_s24, %s42_s24 }
  0x1a   :  { %p1329_p11 = scmp.ne.s32.totalorder %s42_s24, %s1328_s12  ;;  %p1334_p13 = scmp.lt.s32.totalorder %s1328_s12, %s1328_s12 }
  0x1c   :  { %p1335_p0 = por %p1334_p13, %p1333_p12 }
  0x1e   :  { %p1336_p1 = pnand %p1335_p0, %p1329_p11 }
  0x20   :  { %1339 = shalt.err (!%p1336_p1)
}
  0x21   :  { %s1348_s3 = smov 64   ;;  %s1349_s10 = smov 4  }
  0x22   :  { %47 = dma.hbm_to_vmem [thread:$0]  %s1505_s5, 2048, %s42_s24, [#allocation5], %s1348_s3, %s1348_s3, %s1349_s10  }
  0x23   :  { %1340 = dma.done.wait [#allocation3], 8192  }
  0x24   :  { %1341 = vsyncadd [#allocation3], 4294959104 }
  0x25   :  { %1342 = dma.done.wait [#allocation5], 2048  }
  0x26   :  { %1343 = vsyncadd [#allocation5], 4294965248  ;;  %v1350_v0 = vmov 0   ;;  %v1169_v1 = vld [vmem:[%s1501_s1 + $0x4] ss:$16 sps:$4 sm:$0xff]   ;;  %vm114_vm0 = vcmask 130048   ;;  %v69_v50 = vlaneseq }
  0x27   :  { %150 = vmatprep.mubr.bf16.mxu1 %v1350_v0  ;;  %v1171_v2 = vld [vmem:[%s1501_s1] ss:$16 sps:$4 sm:$0xff]   ;;  %118 = vmatprep.subr.bf16.mxu1 %v1169_v1  ;;  %v1173_v4 = vld [vmem:[%s1501_s1 + $0x8] ss:$16 sps:$4 sm:$0xff]   ;;  %v1175_v5 = vld [vmem:[%s1501_s1 + $0xc] ss:$16 sps:$4 sm:$0xff]  }
  0x28   :  { %v1172_v3 = vld [vmem:[%s1500_s0] sm:$0xff]   ;;  %119 = vmatpush1.bf16.msra.mxu1 %v1171_v2  ;;  %v1179_v8 = vld [vmem:[#allocation2 + $0x14] ss:$8 sps:$4 sm:$0xff]   ;;  %v1181_v9 = vld [vmem:[#allocation2 + $0x10] ss:$8 sps:$4 sm:$0xff]   ;;  %v1444_v51 = vshrl.u32 %v69_v50, 7 }
  0x29   :  { %v1176_v6 = vld [vmem:[#allocation2 + $0x4] ss:$8 sps:$4 sm:$0xff]   ;;  %v1178_v7 = vld [vmem:[#allocation2] ss:$8 sps:$4 sm:$0xff]   ;;  %161 = vmatprep.subr.bf16.mxu1 %v1175_v5  ;;  %v1185_v12 = vld [vmem:[#allocation2 + $0x34] ss:$8 sps:$4 sm:$0xff]  }
  0x2a   :  { %612 = vmatprep.subr.bf16.mxu0 %v1176_v6  ;;  %v1182_v10 = vld [vmem:[#allocation2 + $0x24] ss:$8 sps:$4 sm:$0xff]   ;;  %v1184_v11 = vld [vmem:[#allocation2 + $0x20] ss:$8 sps:$4 sm:$0xff]   ;;  %v1187_v13 = vld [vmem:[#allocation2 + $0x30] ss:$8 sps:$4 sm:$0xff]  }
  0x2b   :  { %1009 = vmatmul.mubr.msk.bf16.vlgmr.msra.gmra.mrb[0].mxu1 %vm114_vm0, %v1172_v3  ;;  %613 = vmatpush1.bf16.msra.mxu0 %v1178_v7  ;;  %v1188_v14 = vld [vmem:[#allocation2 + $0x44] ss:$8 sps:$4 sm:$0xff]   ;;  %v1190_v15 = vld [vmem:[#allocation2 + $0x40] ss:$8 sps:$4 sm:$0xff]   ;;  %v1191_v16 = vld [vmem:[#allocation2 + $0x54] ss:$8 sps:$4 sm:$0xff]  }
  0x2c   :  { %162 = vmatpush1.bf16.msra.mxu1 %v1173_v4  ;;  %193 = vmatprep.mubr.bf16.mxu1 %v1350_v0  ;;  %v1193_v17 = vld [vmem:[#allocation2 + $0x50] ss:$8 sps:$4 sm:$0xff]   ;;  %v1194_v18 = vld [vmem:[#allocation2 + $0x64] ss:$8 sps:$4 sm:$0xff]   ;;  %v1196_v19 = vld [vmem:[#allocation2 + $0x60] ss:$8 sps:$4 sm:$0xff]  }
  0x2d   :  { %614 = vmatprep.subr.bf16.mxu0 %v1179_v8  ;;  %v1197_v20 = vld [vmem:[#allocation2 + $0x74] ss:$8 sps:$4 sm:$0xff]   ;;  %v1199_v21 = vld [vmem:[#allocation2 + $0x70] ss:$8 sps:$4 sm:$0xff]   ;;  %v1200_v22 = vld [vmem:[#allocation2 + $0x84] ss:$8 sps:$4 sm:$0xff]  }
  0x2e   :  { %v1202_v23 = vld [vmem:[#allocation2 + $0x80] ss:$8 sps:$4 sm:$0xff]   ;;  %v1203_v24 = vld [vmem:[#allocation2 + $0x94] ss:$8 sps:$4 sm:$0xff]   ;;  %v1205_v25 = vld [vmem:[#allocation2 + $0x90] ss:$8 sps:$4 sm:$0xff]  }
  0x2f   :  { %615 = vmatpush1.bf16.msra.mxu0 %v1181_v9  ;;  %v1206_v26 = vld [vmem:[#allocation2 + $0xa4] ss:$8 sps:$4 sm:$0xff]   ;;  %v1208_v27 = vld [vmem:[#allocation2 + $0xa0] ss:$8 sps:$4 sm:$0xff]   ;;  %v1209_v28 = vld [vmem:[#allocation2 + $0xb4] ss:$8 sps:$4 sm:$0xff]  }
  0x30   :  { %616 = vmatprep.subr.bf16.mxu0 %v1182_v10  ;;  %v1211_v29 = vld [vmem:[#allocation2 + $0xb0] ss:$8 sps:$4 sm:$0xff]   ;;  %v1212_v30 = vld [vmem:[#allocation2 + $0xc4] ss:$8 sps:$4 sm:$0xff]   ;;  %v1214_v31 = vld [vmem:[#allocation2 + $0xc0] ss:$8 sps:$4 sm:$0xff]  }
  0x31   :  { %v1215_v32 = vld [vmem:[#allocation2 + $0xd4] ss:$8 sps:$4 sm:$0xff]   ;;  %v1217_v33 = vld [vmem:[#allocation2 + $0xd0] ss:$8 sps:$4 sm:$0xff]   ;;  %v1218_v34 = vld [vmem:[#allocation2 + $0xe4] ss:$8 sps:$4 sm:$0xff]  }
  0x32   :  { %v1220_v35 = vld [vmem:[#allocation2 + $0xe0] ss:$8 sps:$4 sm:$0xff]   ;;  %v1221_v36 = vld [vmem:[#allocation2 + $0xf4] ss:$8 sps:$4 sm:$0xff]   ;;  %v1223_v37 = vld [vmem:[#allocation2 + $0xf0] ss:$8 sps:$4 sm:$0xff]  }
  0x33   :  { %1010 = vmatmul.mubr.msk.bf16.vlgmr.msra.gmra.mrb[4].mxu1 %vm114_vm0, %v1172_v3  ;;  %617 = vmatpush1.bf16.msra.mxu0 %v1184_v11  ;;  %v1226_v38 = vld [vmem:[#allocation2 + $0x104] ss:$8 sps:$4 sm:$0xff]   ;;  %v1276_v43 = vld [vmem:[#allocation4 + $0x50] sm:$0xff]   ;;  %v1278_v45 = vld [vmem:[#allocation4 + $0x58] sm:$0xff]   ;;  %v71_v52 = vsub.s32 0, %v1444_v51  ;;  %v75_v54 = vsub.s32 1, %v1444_v51 }
  0x34   :  { %618 = vmatprep.subr.bf16.mxu0 %v1185_v12  ;;  %v1272_v39 = vld [vmem:[#allocation4 + $0x40] sm:$0xff]   ;;  %v1274_v41 = vld [vmem:[#allocation4 + $0x48] sm:$0xff]   ;;  %v1277_v44 = vld [vmem:[#allocation4 + $0x10] sm:$0xff]   ;;  %v79_v60 = vsub.s32 2, %v1444_v51  ;;  %v83_v63 = vsub.s32 3, %v1444_v51  ;;  %vm1352_vm1 = vmmov 0  }
  0x35   :  { %v1273_v40 = vld [vmem:[#allocation4] sm:$0xff]   ;;  %1101 = vmatprep.subr.bf16.mxu1 %v1272_v39  ;;  %v1275_v42 = vld [vmem:[#allocation4 + $0x8] sm:$0xff]   ;;  %v1279_v46 = vld [vmem:[#allocation4 + $0x18] sm:$0xff]   ;;  %vm995_vm2 = vcmask 64512  }
  0x36   :  { %1102 = vmatpush3.bf16.msra.mxu1 %v1273_v40  ;;  %v1280_v47 = vld [vmem:[#allocation4 + $0x60] sm:$0xff]   ;;  %v1282_v49 = vld [vmem:[#allocation4 + $0x68] sm:$0xff]   ;;  %v1245_v39 = vld [vmem:[#allocation2 + $0x170] ss:$8 sps:$4 sm:$0xff]  }
  0x37   :  { %619 = vmatpush1.bf16.msra.mxu0 %v1187_v13  ;;  %1103 = vmatprep.subr.bf16.mxu1 %v1274_v41  ;;  %v1281_v48 = vld [vmem:[#allocation4 + $0x20] sm:$0xff]   ;;  %v1229_v13 = vld [vmem:[#allocation2 + $0x114] ss:$8 sps:$4 sm:$0xff]   ;;  %v1289_v51 = vld [vmem:[%s1507_s7 + $0x8] sm:$0xff]  }
  0x38   :  { %620 = vmatprep.subr.bf16.mxu0 %v1188_v14  ;;  %v67_v53 = vld [vmem:[%s1502_s2] sm:$0xf]  ;;  %v1250_v40 = vld [vmem:[#allocation2 + $0x184] ss:$8 sps:$4 sm:$0xff]   ;;  %v1265_v50 = vld [vmem:[#allocation2 + $0x1d4] ss:$8 sps:$4 sm:$0xff]  }
  0x39   :  { %v72_v55 = vrot.slane %v67_v53, %v71_v52  ;;  %v76_v56 = vrot.slane %v67_v53, %v75_v54  ;;  %v80_v5 = vrot.slane %v67_v53, %v79_v60  ;;  %v84_v8 = vrot.slane %v67_v53, %v83_v63  ;;  %v1224_v11 = vld [vmem:[#allocation2 + $0x100] ss:$8 sps:$4 sm:$0xff]   ;;  %v1263_v53 = vld [vmem:[#allocation2 + $0x1d0] ss:$8 sps:$4 sm:$0xff]  }
  0x3a   :  { %1104 = vmatpush3.bf16.msra.mxu1 %v1275_v42  ;;  %v1248_v41 = vld [vmem:[#allocation2 + $0x180] ss:$8 sps:$4 sm:$0xff]   ;;  %v1253_v42 = vld [vmem:[#allocation2 + $0x194] ss:$8 sps:$4 sm:$0xff]  }
  0x3b   :  { %621 = vmatpush1.bf16.msra.mxu0 %v1190_v15  ;;  %1105 = vmatprep.subr.bf16.mxu1 %v1276_v43  ;;  %v1251_v43 = vld [vmem:[#allocation2 + $0x190] ss:$8 sps:$4 sm:$0xff]  }
  0x3c   :  { %622 = vmatprep.subr.bf16.mxu0 %v1191_v16  ;;  %v1284_v60 = vld [vmem:[#allocation4 + $0x70] sm:$0xff]   ;;  %v1287_v63 = vld [vmem:[#allocation4 + $0x38] sm:$0xff]  }
  0x3e   :  { %1106 = vmatpush3.bf16.msra.mxu1 %v1277_v44  ;;  %v1256_v44 = vld [vmem:[#allocation2 + $0x1a4] ss:$8 sps:$4 sm:$0xff]  }
  0x3f   :  { %623 = vmatpush1.bf16.msra.mxu0 %v1193_v17  ;;  %1107 = vmatprep.subr.bf16.mxu1 %v1278_v45  ;;  %v1254_v45 = vld [vmem:[#allocation2 + $0x1a0] ss:$8 sps:$4 sm:$0xff]  }
  0x40   :  { %624 = vmatprep.subr.bf16.mxu0 %v1194_v18 }
  0x42   :  { %1108 = vmatpush3.bf16.msra.mxu1 %v1279_v46  ;;  %v1259_v46 = vld [vmem:[#allocation2 + $0x1b4] ss:$8 sps:$4 sm:$0xff]  }
  0x43   :  { %625 = vmatpush1.bf16.msra.mxu0 %v1196_v19  ;;  %1109 = vmatprep.subr.bf16.mxu1 %v1280_v47  ;;  %v1257_v47 = vld [vmem:[#allocation2 + $0x1b0] ss:$8 sps:$4 sm:$0xff]  }
  0x44   :  { %626 = vmatprep.subr.bf16.mxu0 %v1197_v20 }
  0x46   :  { %1110 = vmatpush3.bf16.msra.mxu1 %v1281_v48  ;;  %v1262_v48 = vld [vmem:[#allocation2 + $0x1c4] ss:$8 sps:$4 sm:$0xff]  }
  0x47   :  { %627 = vmatpush1.bf16.msra.mxu0 %v1199_v21  ;;  %1111 = vmatprep.subr.bf16.mxu1 %v1282_v49  ;;  %v1227_v21 = vld [vmem:[#allocation2 + $0x110] ss:$8 sps:$4 sm:$0xff]   ;;  %v1260_v49 = vld [vmem:[#allocation2 + $0x1c0] ss:$8 sps:$4 sm:$0xff]  }
  0x48   :  { %628 = vmatprep.subr.bf16.mxu0 %v1200_v22 }
  0x4b   :  { %629 = vmatpush1.bf16.msra.mxu0 %v1202_v23 }
  0x4c   :  { %630 = vmatprep.subr.bf16.mxu0 %v1203_v24  ;;  %v1232_v24 = vld [vmem:[#allocation2 + $0x124] ss:$8 sps:$4 sm:$0xff]  }
  0x4f   :  { %631 = vmatpush1.bf16.msra.mxu0 %v1205_v25 }
  0x50   :  { %632 = vmatprep.subr.bf16.mxu0 %v1206_v26 }
  0x53   :  { %633 = vmatpush1.bf16.msra.mxu0 %v1208_v27 }
  0x54   :  { %634 = vmatprep.subr.bf16.mxu0 %v1209_v28  ;;  %v1230_v28 = vld [vmem:[#allocation2 + $0x120] ss:$8 sps:$4 sm:$0xff]  }
  0x57   :  { %635 = vmatpush1.bf16.msra.mxu0 %v1211_v29 }
  0x58   :  { %636 = vmatprep.subr.bf16.mxu0 %v1212_v30  ;;  %v1235_v30 = vld [vmem:[#allocation2 + $0x134] ss:$8 sps:$4 sm:$0xff]  }
  0x5b   :  { %637 = vmatpush1.bf16.msra.mxu0 %v1214_v31  ;;  %v1233_v31 = vld [vmem:[#allocation2 + $0x130] ss:$8 sps:$4 sm:$0xff]  }
  0x5c   :  { %638 = vmatprep.subr.bf16.mxu0 %v1215_v32  ;;  %v1238_v32 = vld [vmem:[#allocation2 + $0x144] ss:$8 sps:$4 sm:$0xff]  }
  0x5f   :  { %639 = vmatpush1.bf16.msra.mxu0 %v1217_v33  ;;  %v1236_v33 = vld [vmem:[#allocation2 + $0x140] ss:$8 sps:$4 sm:$0xff]  }
  0x60   :  { %640 = vmatprep.subr.bf16.mxu0 %v1218_v34  ;;  %v1241_v34 = vld [vmem:[#allocation2 + $0x154] ss:$8 sps:$4 sm:$0xff]  }
  0x63   :  { %641 = vmatpush1.bf16.msra.mxu0 %v1220_v35  ;;  %v1239_v35 = vld [vmem:[#allocation2 + $0x150] ss:$8 sps:$4 sm:$0xff]  }
  0x64   :  { %642 = vmatprep.subr.bf16.mxu0 %v1221_v36  ;;  %v1244_v36 = vld [vmem:[#allocation2 + $0x164] ss:$8 sps:$4 sm:$0xff]  }
  0x67   :  { %643 = vmatpush1.bf16.msra.mxu0 %v1223_v37  ;;  %v1242_v37 = vld [vmem:[#allocation2 + $0x160] ss:$8 sps:$4 sm:$0xff]  }
  0x68   :  { %655 = vmatprep.subr.bf16.mxu0 %v1226_v38  ;;  %v1247_v38 = vld [vmem:[#allocation2 + $0x174] ss:$8 sps:$4 sm:$0xff]  }
  0xfe   :  { %v152_v57 = vpop.f32.mrb[0].mxu1 }
  0xff   :  { %v153_v58 = vadd.f32 %v152_v57, %v72_v55  ;;  %v154_v59 = vpop.f32.mrb[1].mxu1  ;;  %v1271_v57 = vld [vmem:[#allocation2 + $0x1f4] ss:$8 sps:$4 sm:$0xff]  }
 0x100   :  { %v155_v61 = vadd.f32 %v154_v59, %v76_v56  ;;  %v156_v62 = vpop.f32.mrb[2].mxu1  ;;  %v1283_v59 = vld [vmem:[#allocation4 + $0x28] sm:$0xff]  }
 0x101   :  { %v157_v0 = vadd.f32 %v156_v62, %v72_v55  ;;  %v158_v1 = vpop.f32.mrb[3].mxu1  ;;  %v204_v3 = vmax.f32 %v153_v58, 0.0  ;;  %v1268_v55 = vld [vmem:[#allocation2 + $0x1e4] ss:$8 sps:$4 sm:$0xff]   ;;  %v1269_v58 = vld [vmem:[#allocation2 + $0x1f0] ss:$8 sps:$4 sm:$0xff]   ;;  %1112 = vmatpush3.bf16.msra.mxu1 %v1283_v59 }
 0x102   :  { %v159_v2 = vadd.f32 %v158_v1, %v76_v56  ;;  %v205_v6 = vmax.f32 %v155_v61, 0.0  ;;  %v1266_v56 = vld [vmem:[#allocation2 + $0x1e0] ss:$8 sps:$4 sm:$0xff]   ;;  %v1285_v61 = vld [vmem:[#allocation4 + $0x30] sm:$0xff]   ;;  %1113 = vmatprep.subr.bf16.mxu1 %v1284_v60  ;;  %v1286_v62 = vld [vmem:[#allocation4 + $0x78] sm:$0xff]  }
 0x103   :  { %v208_v4 = vmax.f32 %v157_v0, 0.0  ;;  %v1351_v0 = vmov 0.0   ;;  %v280_v1 = vld [vmem:[%s1504_s4] sm:$0x3] }
 0x104   :  { %v209_v7 = vmax.f32 %v159_v2, 0.0  ;;  %v285_v2 = vrot.slane %v280_v1, %v71_v52  ;;  %v1288_v52 = vld [vmem:[%s1507_s7] sm:$0xff]  }
 0x105   :  { %v212_v9 = vpack.c.bf16 %v208_v4, %v204_v3  ;;  %1114 = vmatpush3.bf16.msra.mxu1 %v1285_v61  ;;  %v289_v3 = vrot.slane %v280_v1, %v75_v54  ;;  %v1290_v54 = vld [vmem:[%s1507_s7 + $0x10] sm:$0xff]  }
 0x106   :  { %v213_v10 = vpack.c.bf16 %v209_v7, %v205_v6  ;;  %v195_v12 = vpop.f32.mrb[4].mxu1  ;;  %1115 = vmatprep.subr.bf16.mxu1 %v1286_v62 }
 0x107   :  { %v196_v14 = vadd.f32 %v195_v12, %v80_v5  ;;  %v197_v15 = vpop.f32.mrb[5].mxu1 }
 0x108   :  { %644 = vmatprep.mubr.bf16.mxu0 %v213_v10  ;;  %v198_v16 = vadd.f32 %v197_v15, %v84_v8  ;;  %v199_v17 = vpop.f32.mrb[6].mxu1 }
 0x109   :  { %645 = vmatmul.mubr.bf16.vlgmr.msra.gmra.mrb[0].mxu0 %v212_v9  ;;  %v206_v18 = vmax.f32 %v196_v14, 0.0  ;;  %v200_v19 = vadd.f32 %v199_v17, %v80_v5  ;;  %v201_v20 = vpop.f32.mrb[7].mxu1  ;;  %1116 = vmatpush3.bf16.msra.mxu1 %v1287_v63 }
 0x10a   :  { %656 = vmatpush1.bf16.msra.mxu0 %v1224_v11  ;;  %v207_v22 = vmax.f32 %v198_v16, 0.0  ;;  %v202_v23 = vadd.f32 %v201_v20, %v84_v8  ;;  %1132 = vmatprep.subr.bf16.mxu1 %v1351_v0  ;;  %v1293_v20 = vld [vmem:[%s1507_s7 + $0x28] sm:$0xff]  }
 0x10b   :  { %657 = vmatprep.subr.bf16.mxu0 %v1229_v13  ;;  %v210_v25 = vmax.f32 %v200_v19, 0.0  ;;  %v1292_v19 = vld [vmem:[%s1507_s7 + $0x20] sm:$0xff]  }
 0x10c   :  { %v211_v26 = vmax.f32 %v202_v23, 0.0 }
 0x10d   :  { %v214_v27 = vpack.c.bf16 %v210_v25, %v206_v18  ;;  %v1291_v18 = vld [vmem:[%s1507_s7 + $0x18] sm:$0xff]  }
 0x10e   :  { %658 = vmatpush1.bf16.msra.mxu0 %v1227_v21  ;;  %v215_v29 = vpack.c.bf16 %v211_v26, %v207_v22  ;;  %v1294_v21 = vld [vmem:[%s1507_s7 + $0x30] sm:$0xff]   ;;  %v1295_v22 = vld [vmem:[%s1507_s7 + $0x38] sm:$0xff]  }
 0x10f   :  { %659 = vmatprep.subr.bf16.mxu0 %v1232_v24  ;;  %v1075_v24 = vld [vmem:[%s1506_s6] ss:$0 sm:$0xff] }
 0x110   :  { %687 = vmatprep.mubr.bf16.mxu0 %v215_v29 }
 0x112   :  { %660 = vmatpush1.bf16.msra.mxu0 %v1230_v28 }
 0x113   :  { %661 = vmatprep.subr.bf16.mxu0 %v1235_v30 }
 0x116   :  { %662 = vmatpush1.bf16.msra.mxu0 %v1233_v31 }
 0x117   :  { %663 = vmatprep.subr.bf16.mxu0 %v1238_v32 }
 0x11a   :  { %664 = vmatpush1.bf16.msra.mxu0 %v1236_v33 }
 0x11b   :  { %665 = vmatprep.subr.bf16.mxu0 %v1241_v34 }
 0x11e   :  { %666 = vmatpush1.bf16.msra.mxu0 %v1239_v35  ;;  %v1092_v35 = vld [vmem:[%s1508_s8] ss:$0 sm:$0xff] }
 0x11f   :  { %667 = vmatprep.subr.bf16.mxu0 %v1244_v36 }
 0x122   :  { %668 = vmatpush1.bf16.msra.mxu0 %v1242_v37 }
 0x123   :  { %669 = vmatprep.subr.bf16.mxu0 %v1247_v38 }
 0x126   :  { %670 = vmatpush1.bf16.msra.mxu0 %v1245_v39 }
 0x127   :  { %671 = vmatprep.subr.bf16.mxu0 %v1250_v40 }
 0x12a   :  { %672 = vmatpush1.bf16.msra.mxu0 %v1248_v41 }
 0x12b   :  { %673 = vmatprep.subr.bf16.mxu0 %v1253_v42 }
 0x12e   :  { %674 = vmatpush1.bf16.msra.mxu0 %v1251_v43 }
 0x12f   :  { %675 = vmatprep.subr.bf16.mxu0 %v1256_v44 }
 0x132   :  { %676 = vmatpush1.bf16.msra.mxu0 %v1254_v45 }
 0x133   :  { %677 = vmatprep.subr.bf16.mxu0 %v1259_v46 }
 0x136   :  { %678 = vmatpush1.bf16.msra.mxu0 %v1257_v47 }
 0x137   :  { %679 = vmatprep.subr.bf16.mxu0 %v1262_v48 }
 0x13a   :  { %680 = vmatpush1.bf16.msra.mxu0 %v1260_v49 }
 0x13b   :  { %681 = vmatprep.subr.bf16.mxu0 %v1265_v50 }
 0x13e   :  { %682 = vmatpush1.bf16.msra.mxu0 %v1263_v53 }
 0x13f   :  { %683 = vmatprep.subr.bf16.mxu0 %v1268_v55 }
 0x142   :  { %684 = vmatpush1.bf16.msra.mxu0 %v1266_v56 }
 0x143   :  { %685 = vmatprep.subr.bf16.mxu0 %v1271_v57 }
 0x146   :  { %686 = vmatpush1.bf16.msra.mxu0 %v1269_v58 }
 0x149   :  { %688 = vmatmul.mubr.bf16.vlgmr.msra.gmra.mrb[0].mxu0 %v214_v27 }
 0x21c   :  { %v689_v4 = vpop.f32.mrb[0].mxu0 }
 0x21d   :  { %v1152_v5 = vadd.f32 %v689_v4, %v285_v2  ;;  %v691_v6 = vpop.f32.mrb[1].mxu0 }
 0x21e   :  { %v1153_v7 = vadd.f32 %v691_v6, %v289_v3  ;;  %v693_v8 = vpop.f32.mrb[2].mxu0 }
 0x21f   :  { %v1154_v9 = vadd.f32 %v693_v8, %v285_v2  ;;  %v695_v10 = vpop.f32.mrb[3].mxu0  ;;  %v698_v12 = vmax.f32 %v1152_v5, 0.0 }
 0x220   :  { %v1155_v11 = vadd.f32 %v695_v10, %v289_v3  ;;  %v699_v14 = vmax.f32 %v1153_v7, 0.0 }
 0x221   :  { %v700_v13 = vmax.f32 %v1154_v9, 0.0 }
 0x222   :  { %v701_v15 = vmax.f32 %v1155_v11, 0.0 }
 0x223   :  { %v702_v16 = vpack.c.bf16 %v700_v13, %v698_v12 }
 0x224   :  { %v703_v17 = vpack.c.bf16 %v701_v15, %v699_v14 }
 0x226   :  { %871 = vmatprep.mubr.bf16.mxu1 %v703_v17 }
 0x227   :  { %872 = vmatmul.mubr.bf16.vlgmr.msra.gmra.mrb[8].mxu1 %v702_v16 }
 0x228   :  { %1133 = vmatpush3.bf16.msra.mxu1 %v1288_v52  ;;  %1148 = vmatprep.mubr.msk.bf16.mxu1 %vm1352_vm1, %v1351_v0 }
 0x229   :  { %1134 = vmatprep.subr.bf16.mxu1 %v1351_v0 }
 0x22c   :  { %1135 = vmatpush3.bf16.msra.mxu1 %v1289_v51 }
 0x22d   :  { %1136 = vmatprep.subr.bf16.mxu1 %v1351_v0 }
 0x230   :  { %1137 = vmatpush3.bf16.msra.mxu1 %v1290_v54 }
 0x231   :  { %1138 = vmatprep.subr.bf16.mxu1 %v1351_v0 }
 0x234   :  { %1139 = vmatpush3.bf16.msra.mxu1 %v1291_v18 }
 0x235   :  { %1140 = vmatprep.subr.bf16.mxu1 %v1351_v0 }
 0x238   :  { %1141 = vmatpush3.bf16.msra.mxu1 %v1292_v19 }
 0x239   :  { %1142 = vmatprep.subr.bf16.mxu1 %v1351_v0 }
 0x23c   :  { %1143 = vmatpush3.bf16.msra.mxu1 %v1293_v20 }
 0x23d   :  { %1144 = vmatprep.subr.bf16.mxu1 %v1351_v0 }
 0x240   :  { %1145 = vmatpush3.bf16.msra.mxu1 %v1294_v21 }
 0x241   :  { %1146 = vmatprep.subr.bf16.mxu1 %v1351_v0 }
 0x244   :  { %1147 = vmatpush3.bf16.msra.mxu1 %v1295_v22 }
 0x2fa   :  { %v1117_v23 = vpop.f32.mrb[8].mxu1 }
 0x2fb   :  { %v1118_v25 = vpop.f32.mrb[9].mxu1 }
 0x2fc   :  { %v1119_v26 = vadd.f32 %v1118_v25, %v1117_v23  ;;  %v1120_v27 = vpop.f32.mrb[10].mxu1 }
 0x2fd   :  { %v1121_v28 = vpop.f32.mrb[11].mxu1 }
 0x2fe   :  { %v874_v29 = vadd.f32 %v1119_v26, %v1075_v24  ;;  %v1122_v30 = vadd.f32 %v1121_v28, %v1120_v27 }
 0x300   :  { %v877_v31 = vadd.f32 %v1122_v30, %v1075_v24  ;;  %v880_v32 = vmax.f32 %v874_v29, 0.0 }
 0x302   :  { %v881_v33 = vmax.f32 %v877_v31, 0.0 }
 0x304   :  { %v882_v34 = vpack.c.bf16 %v881_v33, %v880_v32 }
 0x306   :  { %1149 = vmatmul.mubr.bf16.vlgmr.msra.gmra.mrb[12].mxu1 %v882_v34 }
 0x3d9   :  { %v988_v36 = vpop.f32.mrb[12].mxu1 }
 0x3da   :  { %v989_v37 = vadd.f32 %v1092_v35, %v988_v36  ;;  %v1150_v38 = vpop.f32.mrb[13].mxu1 }
 0x3db   :  { %v991_v39 = vpop.f32.mrb[14].mxu1 }
 0x3dc   :  { %996 = vst.msk [vmem:[%s1509_s9] sm:$0xff] %vm995_vm2, %v989_v37  ;;  %v992_v40 = vadd.f32 %v1092_v35, %v991_v39  ;;  %v1151_v41 = vpop.f32.mrb[15].mxu1 }
 0x3de   :  { %997 = vst.msk [vmem:[%s1509_s9 + $0x8] sm:$0xff] %vm995_vm2, %v992_v40 }
 0x3df   :  { %1002 = vsyncpa [#allocation3], 1 }
 0x3e0   :  { %1003 = vsyncpa [#allocation5], 1 }

</bundles_post_ra>
